<compile_context>
chip_gen: v7x
topology: tpu7x:2x2x1
jax: 0.10.0
libtpu: 0.0.40
codegen_flags: <defaults>
</compile_context>

<pallas_src>
import functools

import jax
import jax.numpy as jnp
from jax.experimental import pallas as pl
from jax.experimental.pallas import tpu as pltpu


def _cls_kernel(x_ref, w_ref, b_ref, logits_ref, probs_ref):
    x = x_ref[...]                                            # (tile_b, D)
    logits = jnp.dot(x, w_ref[...],
                     preferred_element_type=jnp.float32) + b_ref[...]
    logits_ref[...] = logits

    # Numerically stable row-wise softmax (matches nn.Softmax(dim=-1)).
    m = jnp.max(logits, axis=-1, keepdims=True)
    e = jnp.exp(logits - m)
    s = jnp.sum(e, axis=-1, keepdims=True)
    probs_ref[...] = e / s


def _choose_tile_b(B, D, C, tile_b):
    """Pick a batch tile: as large as requested, capped by a conservative VMEM
    budget (fits v5e's 16 MiB scoped default and v7x's smaller VMEM), multiple
    of 8, and never larger than the batch itself (so small batches use a
    full-array block, which satisfies the (8,128)/full-dim constraint)."""
    budget_bytes = 12 * 1024 * 1024
    # double-buffered x tile + both double-buffered output tiles, float32
    per_row_bytes = 2 * 4 * (D + 2 * C)
    max_rows = max(8, (budget_bytes // per_row_bytes) // 8 * 8)
    tb = min(tile_b, max_rows)
    if B < tb:
        tb = B   # block == full array dim along batch -> always legal
    return tb


@functools.partial(jax.jit, static_argnames=("tile_b",))
def cls_forward(x, w, b, tile_b=512):
    """x: (B, in_dim) f32; w: (in_dim, num_classes) f32; b: (1, num_classes) f32.

    Returns [x, logits, probs] mirroring CLS.forward's output list."""
    B, D = x.shape
    C = w.shape[1]
    tb = _choose_tile_b(B, D, C, tile_b)
    grid = (pl.cdiv(B, tb),)

    cost = pl.CostEstimate(
        flops=2 * B * D * C,
        transcendentals=B * C,
        bytes_accessed=4 * (B * D + D * C + C + 2 * B * C),
    )

    logits, probs = pl.pallas_call(
        _cls_kernel,
        out_shape=(
            jax.ShapeDtypeStruct((B, C), jnp.float32),
            jax.ShapeDtypeStruct((B, C), jnp.float32),
        ),
        grid_spec=pltpu.PrefetchScalarGridSpec(
            num_scalar_prefetch=0,
            grid=grid,
            in_specs=[
                pl.BlockSpec((tb, D), lambda i: (i, 0)),  # x tile (streams over batch)
                pl.BlockSpec((D, C), lambda i: (0, 0)),   # W (resident: constant block)
                pl.BlockSpec((1, C), lambda i: (0, 0)),   # b (resident: constant block)
            ],
            out_specs=[
                pl.BlockSpec((tb, C), lambda i: (i, 0)),  # logits
                pl.BlockSpec((tb, C), lambda i: (i, 0)),  # softmax probs
            ],
        ),
        compiler_params=pltpu.CompilerParams(
            dimension_semantics=("parallel",),  # batch axis shards across TCs (v7x)
        ),
        cost_estimate=cost,
    )(x, w, b)

    # CLS.forward returns [input, fc(x), softmax(fc(x))].
    return [x, logits, probs]


def init_params(key, in_dim, num_classes):
    """nn.Linear-style init (U(-1/sqrt(fan_in), +1/sqrt(fan_in))), weight stored
    transposed as (in_dim, num_classes) so the kernel computes x @ W + b."""
    kw, kb = jax.random.split(key)
    bound = 1.0 / jnp.sqrt(jnp.float32(in_dim))
    w = jax.random.uniform(kw, (in_dim, num_classes), jnp.float32, -bound, bound)
    b = jax.random.uniform(kb, (1, num_classes), jnp.float32, -bound, bound)
    return w, b


def reference_forward(x, w, b):
    logits = x @ w + b
    probs = jax.nn.softmax(logits, axis=-1)
    return [x, logits, probs]


if __name__ == "__main__":
    key = jax.random.PRNGKey(0)
    kx, kp = jax.random.split(key)

    B, in_dim, num_classes = 2, 32, 16  # small shapes consistent with the module
    x = jax.random.normal(kx, (B, in_dim), jnp.float32)
    w, b = init_params(kp, in_dim, num_classes)

    out = cls_forward(x, w, b)
    out = jax.block_until_ready(out)
    x_out, logits, probs = out

    x_ref, logits_ref, probs_ref = reference_forward(x, w, b)

    assert x_out.shape == (B, in_dim), x_out.shape
    assert logits.shape == (B, num_classes), logits.shape
    assert probs.shape == (B, num_classes), probs.shape
    assert jnp.allclose(x_out, x_ref), "input passthrough mismatch"
    assert jnp.allclose(logits, logits_ref, atol=1e-5, rtol=1e-5), (logits, logits_ref)
    assert jnp.allclose(probs, probs_ref, atol=1e-5, rtol=1e-5), (probs, probs_ref)
    assert jnp.allclose(jnp.sum(probs, axis=-1), 1.0, atol=1e-5), "softmax rows must sum to 1"

    print("KERNEL_OK")
</pallas_src>

<mosaic_0001>
module attributes {stable_mosaic.version = 11 : i64} {
  func.func @_cls_kernel(%arg0: i32, %arg1: memref<2x32xf32, #tpu.memory_space<vmem>>, %arg2: memref<32x16xf32, #tpu.memory_space<vmem>>, %arg3: memref<1x16xf32, #tpu.memory_space<vmem>>, %arg4: memref<2x16xf32, #tpu.memory_space<vmem>>, %arg5: memref<2x16xf32, #tpu.memory_space<vmem>>) attributes {dimension_semantics = [#tpu.dimension_semantics<parallel>], iteration_bounds = array<i64: 1>, scalar_prefetch = 0 : i64, scratch_operands = 0 : i64, tpu.core_type = #tpu.core_type<tc>, window_params = [{transform_indices = @transform_0, window_bounds = array<i64: 2, 32>}, {pipeline_mode = #tpu.pipeline_mode<synchronous>, transform_indices = @transform_1, window_bounds = array<i64: 32, 16>}, {pipeline_mode = #tpu.pipeline_mode<synchronous>, transform_indices = @transform_2, window_bounds = array<i64: 1, 16>}, {transform_indices = @transform_3, window_bounds = array<i64: 2, 16>}, {transform_indices = @transform_4, window_bounds = array<i64: 2, 16>}]} {
    %c0 = arith.constant 0 : index
    %c0_0 = arith.constant 0 : index
    %0 = vector.load %arg1[%c0, %c0_0] : memref<2x32xf32, #tpu.memory_space<vmem>>, vector<2x32xf32>
    %c0_1 = arith.constant 0 : index
    %c0_2 = arith.constant 0 : index
    %1 = vector.load %arg2[%c0_1, %c0_2] : memref<32x16xf32, #tpu.memory_space<vmem>>, vector<32x16xf32>
    %cst = arith.constant dense<0.000000e+00> : vector<2x16xf32>
    %2 = tpu.matmul %0, %1, %cst {dimension_numbers = #tpu.dot_dimension_numbers<[1], [0], [0], [1], [0, 0, 1, 1], [], []>} : vector<2x32xf32>, vector<32x16xf32>, vector<2x16xf32> -> vector<2x16xf32>
    %c0_3 = arith.constant 0 : index
    %c0_4 = arith.constant 0 : index
    %3 = vector.load %arg3[%c0_3, %c0_4] : memref<1x16xf32, #tpu.memory_space<vmem>>, vector<1x16xf32>
    %4 = vector.broadcast %3 : vector<1x16xf32> to vector<2x16xf32>
    %5 = arith.addf %2, %4 : vector<2x16xf32>
    %c0_5 = arith.constant 0 : index
    %c0_6 = arith.constant 0 : index
    %6 = vector.load %arg4[%c0_5, %c0_6] : memref<2x16xf32, #tpu.memory_space<vmem>>, vector<2x16xf32>
    tpu.vector_store %arg4[%c0_5, %c0_6], %5 {strides = array<i32>} : memref<2x16xf32, #tpu.memory_space<vmem>>, vector<2x16xf32>,
    %cst_7 = arith.constant dense<0xFF800000> : vector<2xf32>
    %7 = vector.multi_reduction <maximumf>, %5, %cst_7 [1] : vector<2x16xf32> to vector<2xf32>
    %8 = vector.shape_cast %7 : vector<2xf32> to vector<2x1xf32>
    %9 = vector.broadcast %8 : vector<2x1xf32> to vector<2x16xf32>
    %10 = arith.subf %5, %9 : vector<2x16xf32>
    %11 = math.exp %10 : vector<2x16xf32>
    %cst_8 = arith.constant dense<0.000000e+00> : vector<2xf32>
    %12 = vector.multi_reduction <add>, %11, %cst_8 [1] : vector<2x16xf32> to vector<2xf32>
    %13 = vector.shape_cast %12 : vector<2xf32> to vector<2x1xf32>
    %14 = vector.broadcast %13 : vector<2x1xf32> to vector<2x16xf32>
    %15 = arith.divf %11, %14 : vector<2x16xf32>
    %c0_9 = arith.constant 0 : index
    %c0_10 = arith.constant 0 : index
    %16 = vector.load %arg5[%c0_9, %c0_10] : memref<2x16xf32, #tpu.memory_space<vmem>>, vector<2x16xf32>
    tpu.vector_store %arg5[%c0_9, %c0_10], %15 {strides = array<i32>} : memref<2x16xf32, #tpu.memory_space<vmem>>, vector<2x16xf32>,
    return
  }
  func.func @transform_0(%arg0: i32) -> (i32, i32) {
    %c0_i32 = arith.constant 0 : i32
    %c0_i32_0 = arith.constant 0 : i32
    return %arg0, %c0_i32 : i32, i32
  }
  func.func @transform_1(%arg0: i32) -> (i32, i32) {
    %c0_i32 = arith.constant 0 : i32
    %c0_i32_0 = arith.constant 0 : i32
    %c0_i32_1 = arith.constant 0 : i32
    return %c0_i32, %c0_i32_0 : i32, i32
  }
  func.func @transform_2(%arg0: i32) -> (i32, i32) {
    %c0_i32 = arith.constant 0 : i32
    %c0_i32_0 = arith.constant 0 : i32
    %c0_i32_1 = arith.constant 0 : i32
    return %c0_i32, %c0_i32_0 : i32, i32
  }
  func.func @transform_3(%arg0: i32) -> (i32, i32) {
    %c0_i32 = arith.constant 0 : i32
    %c0_i32_0 = arith.constant 0 : i32
    return %arg0, %c0_i32 : i32, i32
  }
  func.func @transform_4(%arg0: i32) -> (i32, i32) {
    %c0_i32 = arith.constant 0 : i32
    %c0_i32_0 = arith.constant 0 : i32
    return %arg0, %c0_i32 : i32, i32
  }
}

</mosaic_0001>

<bundles_post_ra>
// kernel: cls_forward.1
= control target key start
LH: loop header
LB: loop body
LE: loop exit
PB: predicated region body
PF: predicated region fallthrough
CT: control target
= control target key end

     0   :  { %10 = vsyncpa [#allocation3], 0  ;;  %v227_v3 = vmov 0.0|0.0   ;;  %vm228_vm0 = vmmov 0   ;;  %v229_v6 = vmov 0.0   ;;  %s303_s0 = inlined_call_operand.vmem [shape: f32[2,32], index: 0, kind: input, shape index: {}]   ;;  %s304_s1 = inlined_call_operand.vmem [shape: f32[32,16], index: 1, kind: input, shape index: {}]   ;;  %s305_s2 = inlined_call_operand.vmem [shape: f32[1,16], index: 2, kind: input, shape index: {}]   ;;  %s306_s3 = inlined_call_operand.hbm [shape: f32[2,16], index: 3, kind: output, shape index: {0}]   ;;  %s307_s4 = inlined_call_operand.hbm [shape: f32[2,16], index: 4, kind: output, shape index: {1}]  }
   0x1   :  { %v19_v0 = vld [vmem:[%s304_s1] sm:$0xff]  ;;  %v20_v1 = vld [vmem:[%s304_s1 + $0x8] sm:$0xff]  ;;  %v21_v2 = vld [vmem:[%s304_s1 + $0x10] sm:$0xff]  ;;  %164 = vmatprep.subr.bf16.mxu0 %v227_v3  ;;  %161 = vmatprep.mubr.msk.f32.mxu0 %vm228_vm0, %v229_v6 }
   0x2   :  { %v165_v4 = vpack.c.bf16 %v20_v1, %v19_v0  ;;  %v22_v5 = vld [vmem:[%s304_s1 + $0x18] sm:$0xff] }
   0x3   :  { %11 = vsyncpa [#allocation5], 0  ;;  %v168_v7 = vpack.c.bf16 %v22_v5, %v21_v2  ;;  %v18_v8 = vld [vmem:[%s303_s0] sm:$0x3]  ;;  %vm30_vm1 = vcmask 261120   ;;  %vm104_vm2 = vcmask 123904  }
   0x4   :  { %166 = vmatpush3.bf16.msra.mxu0 %v165_v4  ;;  %v146_v9 = vld [vmem:[%s305_s2] ss:$0 sm:$0xff]  ;;  %s230_s0 = smov [#allocation2]  }
   0x5   :  { %167 = vmatprep.subr.bf16.mxu0 %v227_v3  ;;  %s124_s1 = sshll.u32 %s230_s0, 4  ;;  %s125_s1 = int_to_ptr.vmem [resolvable:$true] %s124_s1 }
   0x6   :  { %s179_s2 = scalar_lea.vmem %s125_s1, 32  ;;  %p184_p1 = scmp.lt.s32.totalorder %s125_s1, %s125_s1 }
   0x7   :  { %p180_p0 = scmp.ne.s32.totalorder %s125_s1, %s179_s2  ;;  %p185_p2 = scmp.lt.s32.totalorder %s179_s2, %s179_s2 }
   0x8   :  { %169 = vmatpush3.bf16.msra.mxu0 %v168_v7 }
   0x9   :  { %p186_p3 = por %p185_p2, %p184_p1 }
   0xb   :  { %162 = vmatmul.mubr.msk.f32.vlgmr.msra.gmra.mrb[0].mxu0 %vm30_vm1, %v18_v8  ;;  %p187_p4 = pnand %p186_p3, %p180_p0 }
  0xde   :  { %v100_v10 = vpop.f32.mrb[0].mxu0 }
  0xdf   :  { %v101_v11 = vadd.f32 %v146_v9, %v100_v10  ;;  %v163_v12 = vpop.f32.mrb[1].mxu0 }
  0xe1   :  { %v106_v13 = vsel %vm104_vm2, %v101_v11, -inf  ;;  %105 = vst.msk [vmem:[#allocation2] sm:$0x3] %vm104_vm2, %v101_v11 }
  0xe2   :  { %107 = vmax.xlane.f32.xlu0 %v106_v13 }
 0x16f   :  { %v108_v14 = vpop.xlane.xlu0 %107 }
 0x170   :  { %v109_v15 = vsub.f32 %v101_v11, %v108_v14 }
 0x172   :  { %v110_v16 = vmul.f32 1.442695, %v109_v15 }
 0x174   :  { %175 = vpow2.f32 %v110_v16 }
 0x17e   :  { %v176_v17 = vpop.eup %175 }
 0x17f   :  { %v112_v18 = vsel %vm104_vm2, %v176_v17, 0.0 }
 0x180   :  { %113 = vadd.xlane.f32.xlu0 %v112_v18 }
 0x181   :  { %190 = shalt.err (!%p187_p4)
}
 0x182   :  { %s191_s29 = scalar_lea.hbm %s306_s3, 32 }
 0x183   :  { %p192_p5 = scmp.ne.s32.totalorder %s306_s3, %s191_s29  ;;  %p195_p6 = scmp.lt.u32.totalorder %s191_s29, %s306_s3 }
 0x185   :  { %p197_p7 = pnand %p195_p6, %p192_p5 }
 0x187   :  { %200 = shalt.err (!%p197_p7)
}
 0x188   :  { %127 = dma.vmem_to_hbm [thread:$0]  %s125_s1, 32, %s306_s3, [#allocation3]  }
 0x189   :  { %s231_s10 = smov [#allocation4]  }
 0x18a   :  { %s134_s11 = sshll.u32 %s231_s10, 4  ;;  %s135_s11 = int_to_ptr.vmem [resolvable:$true] %s134_s11 }
 0x18b   :  { %s201_s12 = scalar_lea.vmem %s135_s11, 32  ;;  %p206_p9 = scmp.lt.s32.totalorder %s135_s11, %s135_s11 }
 0x18c   :  { %p202_p8 = scmp.ne.s32.totalorder %s135_s11, %s201_s12  ;;  %p207_p10 = scmp.lt.s32.totalorder %s201_s12, %s201_s12 }
 0x18e   :  { %p208_p11 = por %p207_p10, %p206_p9 }
 0x190   :  { %p209_p12 = pnand %p208_p11, %p202_p8 }
 0x20d   :  { %v114_v19 = vpop.xlane.xlu0 %113 }
 0x20e   :  { %177 = vrcp.f32 %v114_v19 }
 0x218   :  { %v178_v20 = vpop.eup %177 }
 0x219   :  { %v116_v21 = vmul.f32 %v178_v20, %v176_v17 }
 0x21b   :  { %117 = vst.msk [vmem:[#allocation4] sm:$0x3] %vm104_vm2, %v116_v21 }
 0x21c   :  { %212 = shalt.err (!%p209_p12)
}
 0x21d   :  { %s213_s3 = scalar_lea.hbm %s307_s4, 32 }
 0x21e   :  { %p214_p13 = scmp.ne.s32.totalorder %s307_s4, %s213_s3  ;;  %p217_p0 = scmp.lt.u32.totalorder %s213_s3, %s307_s4 }
 0x220   :  { %p219_p1 = pnand %p217_p0, %p214_p13 }
 0x222   :  { %222 = shalt.err (!%p219_p1)
}
 0x223   :  { %137 = dma.vmem_to_hbm [thread:$0]  %s135_s11, 32, %s307_s4, [#allocation5]  }
 0x224   :  { %223 = dma.done.wait [#allocation3], 32  }
 0x225   :  { %224 = vsyncadd [#allocation3], 4294967264 }
 0x226   :  { %225 = dma.done.wait [#allocation5], 32  }
 0x227   :  { %226 = vsyncadd [#allocation5], 4294967264 }
 0x228   :  { %144 = vsyncpa [#allocation3], 1 }
 0x229   :  { %145 = vsyncpa [#allocation5], 1 }

</bundles_post_ra>
